<compile_context>
chip_gen: v7x
topology: tpu7x:2x2x1
jax: 0.10.0
libtpu: 0.0.40
codegen_flags: <defaults>
</compile_context>

<pallas_src>
import numpy as np
import jax
import jax.numpy as jnp
from jax import lax
from jax.experimental import pallas as pl
from jax.experimental.pallas import tpu as pltpu


# Set to jnp.bfloat16 on v5e/v6e for higher MXU throughput + halved weight DMA
# (accumulation stays f32).  Kept f32 by default for exact PyTorch parity.
MATMUL_DTYPE = jnp.float32

# Comfortably below v7x's 64 MiB physical VMEM; our resident blocks are ~3 MiB.
_VMEM_LIMIT = 48 * 1024 * 1024


def _round_up(x, m):
    return (x + m - 1) // m * m


# --------------------------------------------------------------------------- GELU
def _erf_approx(x):
    # Abramowitz–Stegun 7.1.26; exp lands on the EUP, polynomial is VPU filler.
    p = 0.3275911
    a1, a2, a3, a4, a5 = 0.254829592, -0.284496736, 1.421413741, -1.453152027, 1.061405429
    ax = jnp.abs(x)
    t = 1.0 / (1.0 + p * ax)
    poly = ((((a5 * t + a4) * t + a3) * t + a2) * t + a1) * t
    y = 1.0 - poly * jnp.exp(-ax * ax)
    return jnp.where(x >= 0, y, -y)


def _gelu_exact(x):
    return 0.5 * x * (1.0 + _erf_approx(x * 0.7071067811865476))


# --------------------------------------------------- kernel 1: tiled act(x @ w + b)
def _make_matmul_kernel(activation):
    def kernel(x_ref, w_ref, b_ref, o_ref, acc_ref):
        @pl.when(pl.program_id(2) == 0)
        def _():
            acc_ref[...] = jnp.zeros_like(acc_ref)

        acc_ref[...] += jnp.dot(x_ref[...], w_ref[...],
                                preferred_element_type=jnp.float32)

        @pl.when(pl.program_id(2) == pl.num_programs(2) - 1)
        def _():
            o_ref[...] = activation(acc_ref[...] + b_ref[...]).astype(o_ref.dtype)
    return kernel


def matmul_bias_act(x, w, b=None, activation=None, tm=256, tn=256, tk=512):
    """Tiled `act(x @ w + b)`.  x:(M,K), w:(K,N), b:(1,N) or None.  Returns f32 (M,N)."""
    M, K = x.shape
    K2, N = w.shape
    assert K == K2
    act = activation if activation is not None else (lambda v: v)
    b = jnp.zeros((1, N), jnp.float32) if b is None else b.reshape(1, N).astype(jnp.float32)

    # A block dim must be a multiple of (8, 128) on the last two axes OR span the
    # full array dim; shrink the tile to the whole axis when it already fits.
    if M <= tm:
        tm, Mp = M, M
    else:
        Mp = _round_up(M, tm)
    if N <= tn:
        tn, Np = N, N
    else:
        Np = _round_up(N, tn)
    if K <= tk:
        tk, Kp = K, K
    else:
        Kp = _round_up(K, tk)

    x = x.astype(MATMUL_DTYPE)
    w = w.astype(MATMUL_DTYPE)
    if (Mp, Kp) != (M, K):
        x = jnp.pad(x, ((0, Mp - M), (0, Kp - K)))
    if (Kp, Np) != (K, N):
        w = jnp.pad(w, ((0, Kp - K), (0, Np - N)))
    if Np != N:
        b = jnp.pad(b, ((0, 0), (0, Np - N)))

    out = pl.pallas_call(
        _make_matmul_kernel(act),
        out_shape=jax.ShapeDtypeStruct((Mp, Np), jnp.float32),
        grid=(Mp // tm, Np // tn, Kp // tk),
        in_specs=[pl.BlockSpec((tm, tk), lambda i, j, k: (i, k)),
                  pl.BlockSpec((tk, tn), lambda i, j, k: (k, j)),
                  pl.BlockSpec((1, tn), lambda i, j, k: (0, j))],
        out_specs=pl.BlockSpec((tm, tn), lambda i, j, k: (i, j)),
        scratch_shapes=[pltpu.VMEM((tm, tn), jnp.float32)],
        compiler_params=pltpu.CompilerParams(
            dimension_semantics=("parallel", "parallel", "arbitrary"),
            vmem_limit_bytes=_VMEM_LIMIT),
    )(x, w, b)
    return out if (Mp, Np) == (M, N) else out[:M, :N]


# -------------------------------------- kernel 2: GELU(a @ wa + b @ wb) (fused concat)
def _dual_matmul_gelu_kernel(a_ref, b_ref, wa_ref, wb_ref, o_ref):
    y = jnp.dot(a_ref[...], wa_ref[...], preferred_element_type=jnp.float32)
    y = y + jnp.dot(b_ref[...], wb_ref[...], preferred_element_type=jnp.float32)
    o_ref[...] = _gelu_exact(y)


def dual_matmul_gelu(a, b, wa, wb, tm=256, tn=256):
    """GELU(a @ wa + b @ wb): fuses the (h_fwd | h_bwd) concat into lstm_proj."""
    M, Ka = a.shape
    Mb, Kb = b.shape
    _, N = wa.shape
    assert M == Mb and wa.shape[0] == Ka and wb.shape == (Kb, N)

    if M <= tm:
        tm, Mp = M, M
    else:
        Mp = _round_up(M, tm)
    if N <= tn:
        tn, Np = N, N
    else:
        Np = _round_up(N, tn)

    a = a.astype(MATMUL_DTYPE)
    b = b.astype(MATMUL_DTYPE)
    wa = wa.astype(MATMUL_DTYPE)
    wb = wb.astype(MATMUL_DTYPE)
    if Mp != M:
        a = jnp.pad(a, ((0, Mp - M), (0, 0)))
        b = jnp.pad(b, ((0, Mp - M), (0, 0)))
    if Np != N:
        wa = jnp.pad(wa, ((0, 0), (0, Np - N)))
        wb = jnp.pad(wb, ((0, 0), (0, Np - N)))

    out = pl.pallas_call(
        _dual_matmul_gelu_kernel,
        out_shape=jax.ShapeDtypeStruct((Mp, Np), jnp.float32),
        grid=(Mp // tm, Np // tn),
        in_specs=[pl.BlockSpec((tm, Ka), lambda i, j: (i, 0)),
                  pl.BlockSpec((tm, Kb), lambda i, j: (i, 0)),
                  pl.BlockSpec((Ka, tn), lambda i, j: (0, j)),
                  pl.BlockSpec((Kb, tn), lambda i, j: (0, j))],
        out_specs=pl.BlockSpec((tm, tn), lambda i, j: (i, j)),
        compiler_params=pltpu.CompilerParams(
            dimension_semantics=("parallel", "parallel"),
            vmem_limit_bytes=_VMEM_LIMIT),
    )(a, b, wa, wb)
    return out if (Mp, Np) == (M, N) else out[:M, :N]


# --------------------------------------- kernel 3: bidirectional packed-LSTM recurrence
def _bilstm_kernel(len_ref, g_ref, whh_ref, o_ref, h_scr, c_scr):
    d = pl.program_id(0)         # 0 = forward direction, 1 = backward direction
    ci = pl.program_id(1)        # chunk counter within this direction
    nc = pl.num_programs(1)

    @pl.when(ci == 0)
    def _():                     # zero initial (h, c) at the start of each direction
        h_scr[...] = jnp.zeros_like(h_scr)
        c_scr[...] = jnp.zeros_like(c_scr)

    Tt = g_ref.shape[0]
    H = h_scr.shape[-1]
    whh = whh_ref[0]                        # (H, 4H)  this direction's W_hh
    lens = len_ref[...]                     # (Bp, 1)  int32 sequence lengths
    chunk = ci + d * (nc - 1 - 2 * ci)      # time-chunk walked by this grid step
    t_base = chunk * Tt

    def step(tt, carry):
        h, c = carry
        t_local = tt + d * (Tt - 1 - 2 * tt)    # fwd: 0..Tt-1, bwd: Tt-1..0
        t_glob = t_base + t_local
        # Only the small recurrent matmul stays inside the time loop; the input
        # projection (x @ W_ih + b) was hoisted into one big matmul outside.
        gates = g_ref[t_local] + jnp.dot(h, whh, preferred_element_type=jnp.float32)
        i_g = jax.nn.sigmoid(gates[:, 0 * H:1 * H])          # PyTorch order: i,f,g,o
        f_g = jax.nn.sigmoid(gates[:, 1 * H:2 * H])
        g_g = jnp.tanh(gates[:, 2 * H:3 * H])
        o_g = jax.nn.sigmoid(gates[:, 3 * H:4 * H])
        c_new = f_g * c + i_g * g_g
        h_new = o_g * jnp.tanh(c_new)
        # Packed-sequence semantics: positions past each sequence's length never
        # update the state (so the backward pass effectively starts at t = len-1),
        # and their outputs are zero (pad_packed_sequence behavior).
        valid = t_glob < lens                                  # (Bp, 1) broadcast
        h_new = jnp.where(valid, h_new, h)
        c_new = jnp.where(valid, c_new, c)
        o_ref[0, pl.ds(t_local, 1)] = jnp.where(valid, h_new, 0.0)[None]
        return h_new, c_new

    h_fin, c_fin = lax.fori_loop(0, Tt, step, (h_scr[...], c_scr[...]), unroll=True)
    h_scr[...] = h_fin
    c_scr[...] = c_fin


def bilstm_packed(gates, whh_stack, lengths_col, hidden, t_chunk):
    """Bidirectional LSTM over precomputed input gates.
    gates: (T_pad, Bp, 8H) = x @ [W_ih_fwd | W_ih_bwd] + b; whh_stack: (2, H, 4H);
    lengths_col: (Bp, 1) int32.  Returns (2, T_pad, Bp, H), zero past each length."""
    T_pad, Bp, _ = gates.shape
    H = hidden
    nc = T_pad // t_chunk

    def g_map(d, c):             # fwd walks chunks 0..nc-1, bwd walks nc-1..0
        return (c + d * (nc - 1 - 2 * c), 0, d)

    def o_map(d, c):
        return (d, c + d * (nc - 1 - 2 * c), 0, 0)

    return pl.pallas_call(
        _bilstm_kernel,
        out_shape=jax.ShapeDtypeStruct((2, T_pad, Bp, H), jnp.float32),
        grid=(2, nc),
        in_specs=[pl.BlockSpec((Bp, 1), lambda d, c: (0, 0)),
                  pl.BlockSpec((t_chunk, Bp, 4 * H), g_map),
                  pl.BlockSpec((1, H, 4 * H), lambda d, c: (d, 0, 0))],
        out_specs=pl.BlockSpec((1, t_chunk, Bp, H), o_map),
        scratch_shapes=[pltpu.VMEM((Bp, H), jnp.float32),    # h state
                        pltpu.VMEM((Bp, H), jnp.float32)],   # c state
        compiler_params=pltpu.CompilerParams(
            # Direction axis is embarrassingly parallel (splits across the two TCs
            # on v7x); the chunk axis carries the recurrence and must stay serial.
            dimension_semantics=("parallel", "arbitrary"),
            vmem_limit_bytes=_VMEM_LIMIT),
    )(lengths_col, gates, whh_stack)


# ------------------------------------------------------------------------ parameters
def init_params(key, vocab_size, wordvec_dim, embed_dim):
    H = embed_dim
    ks = jax.random.split(key, 9)
    kbound = 1.0 / np.sqrt(H)
    u = lambda kk, shape: jax.random.uniform(kk, shape, jnp.float32, -kbound, kbound)
    return dict(
        embed_w=jax.random.normal(ks[0], (vocab_size, wordvec_dim), jnp.float32),
        proj_w=jax.random.normal(ks[1], (wordvec_dim, embed_dim), jnp.float32) * 0.1,
        lstm_proj_w=jax.random.normal(ks[2], (2 * embed_dim, embed_dim), jnp.float32) * 0.1,
        # PyTorch stores weight_ih (4H, E) / weight_hh (4H, H); we keep them
        # pre-transposed for right-multiplication and fold b_ih + b_hh into (1, 4H).
        wih_fwd=u(ks[3], (embed_dim, 4 * H)),
        whh_fwd=u(ks[4], (H, 4 * H)),
        b_fwd=u(ks[5], (1, 4 * H)),
        wih_bwd=u(ks[6], (embed_dim, 4 * H)),
        whh_bwd=u(ks[7], (H, 4 * H)),
        b_bwd=u(ks[8], (1, 4 * H)),
    )


# ---------------------------------------------------------------------- full forward
def textembedding_forward(params, text, text_len):
    B, T = text.shape
    E = params["proj_w"].shape[1]          # embed_dim == LSTM hidden size
    H = E
    # TODO(synk): pad H (and the gate weights) up to a multiple of 32 if needed.
    assert (4 * H) % 128 == 0, "embed_dim must be a multiple of 32"

    lengths = jnp.asarray(text_len, jnp.int32)
    T_out = int(np.max(np.asarray(text_len)))       # pad_packed total_length=None

    # Pad batch to a sublane multiple and time to a whole number of LSTM chunks.
    Bp = _round_up(B, 8)
    t_chunk = 8 if T <= 16 else 16
    T_pad = _round_up(T, t_chunk)

    # 1) Embedding lookup (frozen table) — gather stays in JAX glue.
    emb = params["embed_w"][text]                                    # (B, T, Dw)
    emb = jnp.pad(emb, ((0, Bp - B), (0, T_pad - T), (0, 0)))
    emb_tm = jnp.transpose(emb, (1, 0, 2)).reshape(T_pad * Bp, -1)   # time-major rows

    # 2) embedding_proj: Dropout(id) -> Linear(no bias) -> GELU          [Pallas]
    x = matmul_bias_act(emb_tm, params["proj_w"], activation=_gelu_exact)  # (T_pad*Bp, E)

    # 3a) LSTM input projection hoisted out of the recurrence, both directions at
    #     once: x @ [W_ih_fwd | W_ih_bwd] + (b_fwd | b_bwd).              [Pallas]
    wih_cat = jnp.concatenate([params["wih_fwd"], params["wih_bwd"]], axis=1)  # (E, 8H)
    b_cat = jnp.concatenate([params["b_fwd"], params["b_bwd"]], axis=1)        # (1, 8H)
    gates = matmul_bias_act(x, wih_cat, b=b_cat).reshape(T_pad, Bp, 8 * H)

    # 3b) Bidirectional recurrence in one pallas_call; packed-sequence masking and
    #     the backward-direction reversal are fused into the kernel.     [Pallas]
    whh_stack = jnp.stack([params["whh_fwd"], params["whh_bwd"]], axis=0)      # (2, H, 4H)
    len_col = jnp.pad(lengths, (0, Bp - B)).reshape(Bp, 1)
    h = bilstm_packed(gates, whh_stack, len_col, H, t_chunk)     # (2, T_pad, Bp, H)

    # 4) lstm_proj: Linear(no bias) -> GELU -> Dropout(id); the (h_fwd | h_bwd)
    #    concat is fused into a dual-operand matmul.                     [Pallas]
    h_fwd = h[0, :T_out].reshape(T_out * Bp, H)
    h_bwd = h[1, :T_out].reshape(T_out * Bp, H)
    y = dual_matmul_gelu(h_fwd, h_bwd,
                         params["lstm_proj_w"][:H], params["lstm_proj_w"][H:])

    # 5) Already time-major == PyTorch `.transpose(0, 1)`; drop batch padding.
    return y.reshape(T_out, Bp, E)[:, :B, :]                         # (T_out, B, E)


# ------------------------------------------------------------------------------ demo
if __name__ == "__main__":
    vocab_size, wordvec_dim, embed_dim = 100, 24, 32
    B, T = 2, 8

    key = jax.random.PRNGKey(0)
    pkey, tkey = jax.random.split(key)
    params = init_params(pkey, vocab_size, wordvec_dim, embed_dim)

    text = jax.random.randint(tkey, (B, T), 0, vocab_size, dtype=jnp.int32)
    text_len = np.array([8, 5], dtype=np.int32)   # variable lengths, batch_first

    out = textembedding_forward(params, text, text_len)
    out = jax.block_until_ready(out)

    assert out.shape == (int(text_len.max()), B, embed_dim), out.shape
    assert bool(jnp.all(jnp.isfinite(out)))
    print("KERNEL_OK")
</pallas_src>

<mosaic_0001>
module attributes {stable_mosaic.version = 11 : i64} {
  func.func @kernel(%arg0: i32, %arg1: i32, %arg2: i32, %arg3: memref<64x24xf32, #tpu.memory_space<vmem>>, %arg4: memref<24x32xf32, #tpu.memory_space<vmem>>, %arg5: memref<1x32xf32, #tpu.memory_space<vmem>>, %arg6: memref<64x32xf32, #tpu.memory_space<vmem>>, %arg7: memref<64x32xf32, #tpu.memory_space<vmem>>) attributes {dimension_semantics = [#tpu.dimension_semantics<parallel>, #tpu.dimension_semantics<parallel>, #tpu.dimension_semantics<arbitrary>], iteration_bounds = array<i64: 1, 1, 1>, scalar_prefetch = 0 : i64, scratch_operands = 1 : i64, tpu.core_type = #tpu.core_type<tc>, window_params = [{transform_indices = @transform_0, window_bounds = array<i64: 64, 24>}, {transform_indices = @transform_1, window_bounds = array<i64: 24, 32>}, {transform_indices = @transform_2, window_bounds = array<i64: 1, 32>}, {transform_indices = @transform_3, window_bounds = array<i64: 64, 32>}]} {
    %c0_i32 = arith.constant 0 : i32
    %0 = arith.cmpi eq, %arg2, %c0_i32 : i32
    %1 = arith.extui %0 : i1 to i32
    %c0_i32_0 = arith.constant 0 : i32
    %2 = arith.cmpi ne, %1, %c0_i32_0 : i32
    scf.if %2 {
      %cst_10 = arith.constant 0.000000e+00 : f32
      %12 = vector.broadcast %cst_10 : f32 to vector<64x32xf32>
      %c0_11 = arith.constant 0 : index
      %c0_12 = arith.constant 0 : index
      %13 = vector.load %arg7[%c0_11, %c0_12] : memref<64x32xf32, #tpu.memory_space<vmem>>, vector<64x32xf32>
      tpu.vector_store %arg7[%c0_11, %c0_12], %12 {strides = array<i32>} : memref<64x32xf32, #tpu.memory_space<vmem>>, vector<64x32xf32>,
    } else {
    }
    %c0 = arith.constant 0 : index
    %c0_1 = arith.constant 0 : index
    %3 = vector.load %arg7[%c0, %c0_1] : memref<64x32xf32, #tpu.memory_space<vmem>>, vector<64x32xf32>
    %c0_2 = arith.constant 0 : index
    %c0_3 = arith.constant 0 : index
    %4 = vector.load %arg3[%c0_2, %c0_3] : memref<64x24xf32, #tpu.memory_space<vmem>>, vector<64x24xf32>
    %c0_4 = arith.constant 0 : index
    %c0_5 = arith.constant 0 : index
    %5 = vector.load %arg4[%c0_4, %c0_5] : memref<24x32xf32, #tpu.memory_space<vmem>>, vector<24x32xf32>
    %cst = arith.constant dense<0.000000e+00> : vector<64x32xf32>
    %6 = tpu.matmul %4, %5, %cst {dimension_numbers = #tpu.dot_dimension_numbers<[1], [0], [0], [1], [0, 0, 1, 1], [], []>} : vector<64x24xf32>, vector<24x32xf32>, vector<64x32xf32> -> vector<64x32xf32>
    %7 = arith.addf %3, %6 : vector<64x32xf32>
    %c0_6 = arith.constant 0 : index
    %c0_7 = arith.constant 0 : index
    %8 = vector.load %arg7[%c0_6, %c0_7] : memref<64x32xf32, #tpu.memory_space<vmem>>, vector<64x32xf32>
    tpu.vector_store %arg7[%c0_6, %c0_7], %7 {strides = array<i32>} : memref<64x32xf32, #tpu.memory_space<vmem>>, vector<64x32xf32>,
    %c0_i32_8 = arith.constant 0 : i32
    %9 = arith.cmpi eq, %arg2, %c0_i32_8 : i32
    %10 = arith.extui %9 : i1 to i32
    %c0_i32_9 = arith.constant 0 : i32
    %11 = arith.cmpi ne, %10, %c0_i32_9 : i32
    scf.if %11 {
      %c0_10 = arith.constant 0 : index
      %c0_11 = arith.constant 0 : index
      %12 = vector.load %arg7[%c0_10, %c0_11] : memref<64x32xf32, #tpu.memory_space<vmem>>, vector<64x32xf32>
      %c0_12 = arith.constant 0 : index
      %c0_13 = arith.constant 0 : index
      %13 = vector.load %arg5[%c0_12, %c0_13] : memref<1x32xf32, #tpu.memory_space<vmem>>, vector<1x32xf32>
      %14 = vector.broadcast %13 : vector<1x32xf32> to vector<64x32xf32>
      %15 = arith.addf %12, %14 : vector<64x32xf32>
      %cst_14 = arith.constant 5.000000e-01 : f32
      %16 = vector.broadcast %cst_14 : f32 to vector<64x32xf32>
      %17 = arith.mulf %16, %15 : vector<64x32xf32>
      %cst_15 = arith.constant 0.707106769 : f32
      %18 = vector.broadcast %cst_15 : f32 to vector<64x32xf32>
      %19 = arith.mulf %15, %18 : vector<64x32xf32>
      %20 = math.absf %19 : vector<64x32xf32>
      %cst_16 = arith.constant 0.327591091 : f32
      %21 = vector.broadcast %cst_16 : f32 to vector<64x32xf32>
      %22 = arith.mulf %21, %20 : vector<64x32xf32>
      %cst_17 = arith.constant 1.000000e+00 : f32
      %23 = vector.broadcast %cst_17 : f32 to vector<64x32xf32>
      %24 = arith.addf %23, %22 : vector<64x32xf32>
      %cst_18 = arith.constant 1.000000e+00 : f32
      %25 = vector.broadcast %cst_18 : f32 to vector<64x32xf32>
      %26 = arith.divf %25, %24 : vector<64x32xf32>
      %cst_19 = arith.constant 1.06140542 : f32
      %27 = vector.broadcast %cst_19 : f32 to vector<64x32xf32>
      %28 = arith.mulf %27, %26 : vector<64x32xf32>
      %cst_20 = arith.constant -1.45315206 : f32
      %29 = vector.broadcast %cst_20 : f32 to vector<64x32xf32>
      %30 = arith.addf %28, %29 : vector<64x32xf32>
      %31 = arith.mulf %30, %26 : vector<64x32xf32>
      %cst_21 = arith.constant 1.42141378 : f32
      %32 = vector.broadcast %cst_21 : f32 to vector<64x32xf32>
      %33 = arith.addf %31, %32 : vector<64x32xf32>
      %34 = arith.mulf %33, %26 : vector<64x32xf32>
      %cst_22 = arith.constant -0.284496725 : f32
      %35 = vector.broadcast %cst_22 : f32 to vector<64x32xf32>
      %36 = arith.addf %34, %35 : vector<64x32xf32>
      %37 = arith.mulf %36, %26 : vector<64x32xf32>
      %cst_23 = arith.constant 0.254829586 : f32
      %38 = vector.broadcast %cst_23 : f32 to vector<64x32xf32>
      %39 = arith.addf %37, %38 : vector<64x32xf32>
      %40 = arith.mulf %39, %26 : vector<64x32xf32>
      %cst_24 = arith.constant 0.000000e+00 : f32
      %41 = vector.broadcast %cst_24 : f32 to vector<64x32xf32>
      %42 = arith.subf %41, %20 : vector<64x32xf32>
      %43 = arith.mulf %42, %20 : vector<64x32xf32>
      %44 = math.exp %43 : vector<64x32xf32>
      %45 = arith.mulf %40, %44 : vector<64x32xf32>
      %cst_25 = arith.constant 1.000000e+00 : f32
      %46 = vector.broadcast %cst_25 : f32 to vector<64x32xf32>
      %47 = arith.subf %46, %45 : vector<64x32xf32>
      %cst_26 = arith.constant 0.000000e+00 : f32
      %48 = vector.broadcast %cst_26 : f32 to vector<64x32xf32>
      %49 = arith.cmpf oge, %19, %48 : vector<64x32xf32>
      %cst_27 = arith.constant 0.000000e+00 : f32
      %50 = vector.broadcast %cst_27 : f32 to vector<64x32xf32>
      %51 = arith.subf %50, %47 : vector<64x32xf32>
      %52 = arith.select %49, %47, %51 : vector<64x32xi1>, vector<64x32xf32>
      %cst_28 = arith.constant 1.000000e+00 : f32
      %53 = vector.broadcast %cst_28 : f32 to vector<64x32xf32>
      %54 = arith.addf %53, %52 : vector<64x32xf32>
      %55 = arith.mulf %17, %54 : vector<64x32xf32>
      %c0_29 = arith.constant 0 : index
      %c0_30 = arith.constant 0 : index
      %56 = vector.load %arg6[%c0_29, %c0_30] : memref<64x32xf32, #tpu.memory_space<vmem>>, vector<64x32xf32>
      tpu.vector_store %arg6[%c0_29, %c0_30], %55 {strides = array<i32>} : memref<64x32xf32, #tpu.memory_space<vmem>>, vector<64x32xf32>,
    } else {
    }
    return
  }
  func.func @transform_0(%arg0: i32, %arg1: i32, %arg2: i32) -> (i32, i32) {
    %c0_i32 = arith.constant 0 : i32
    return %arg0, %arg2 : i32, i32
  }
  func.func @transform_1(%arg0: i32, %arg1: i32, %arg2: i32) -> (i32, i32) {
    %c0_i32 = arith.constant 0 : i32
    return %arg2, %arg1 : i32, i32
  }
  func.func @transform_2(%arg0: i32, %arg1: i32, %arg2: i32) -> (i32, i32) {
    %c0_i32 = arith.constant 0 : i32
    %c0_i32_0 = arith.constant 0 : i32
    return %c0_i32, %arg1 : i32, i32
  }
  func.func @transform_3(%arg0: i32, %arg1: i32, %arg2: i32) -> (i32, i32) {
    %c0_i32 = arith.constant 0 : i32
    return %arg0, %arg1 : i32, i32
  }
}

</mosaic_0001>

<bundles_post_ra>
// kernel: tpu_custom_call.1
= control target key start
LH: loop header
LB: loop body
LE: loop exit
PB: predicated region body
PF: predicated region fallthrough
CT: control target
= control target key end

     0   :  { %vm46_vm0 = vcmask 195584   ;;  %vm18_vm1 = vcmask 261120   ;;  %v526_v2 = vmov 0.0   ;;  %s776_s1 = inlined_call_operand.vmem [shape: f32[24,32], index: 1, kind: input, shape index: {}]   ;;  %s777_s0 = inlined_call_operand.vmem [shape: f32[64,24], index: 0, kind: input, shape index: {}]   ;;  %s778_s2 = inlined_call_operand.vmem [shape: f32[1,32], index: 2, kind: input, shape index: {}]   ;;  %s779_s3 = inlined_call_operand.vmem [shape: f32[64,32], index: 3, kind: output, shape index: {}]  }
   0x1   :  { %v43_v0 = vld [vmem:[%s776_s1] sm:$0xff]  ;;  %v44_v1 = vld [vmem:[%s776_s1 + $0x8] sm:$0xff]  ;;  %20 = vst.msk [vmem:[#allocation2 + $0x8] sm:$0xff] %vm18_vm1, %v526_v2  ;;  %19 = vst.msk [vmem:[#allocation2] sm:$0xff] %vm18_vm1, %v526_v2 }
   0x2   :  { %21 = vst.msk [vmem:[#allocation2 + $0x10] sm:$0xff] %vm18_vm1, %v526_v2  ;;  %22 = vst.msk [vmem:[#allocation2 + $0x18] sm:$0xff] %vm18_vm1, %v526_v2  ;;  %v485_v3 = vpack.c.bf16 %v44_v1, %v43_v0  ;;  %v35_v4 = vld [vmem:[%s777_s0] sm:$0xff]  ;;  %v45_v6 = vld [vmem:[%s776_s1 + $0x10] sm:$0xff] }
   0x3   :  { %23 = vst.msk [vmem:[#allocation2 + $0x20] sm:$0xff] %vm18_vm1, %v526_v2  ;;  %24 = vst.msk [vmem:[#allocation2 + $0x28] sm:$0xff] %vm18_vm1, %v526_v2  ;;  %v39_v5 = vld [vmem:[%s777_s0 + $0x20] sm:$0xff]  ;;  %473 = vmatprep.mubr.msk.f32.mxu0 %vm46_vm0, %v35_v4  ;;  %v36_v7 = vld [vmem:[%s777_s0 + $0x8] sm:$0xff] }
   0x4   :  { %25 = vst.msk [vmem:[#allocation2 + $0x30] sm:$0xff] %vm18_vm1, %v526_v2  ;;  %26 = vst.msk [vmem:[#allocation2 + $0x38] sm:$0xff] %vm18_vm1, %v526_v2  ;;  %479 = vmatprep.mubr.msk.f32.mxu1 %vm46_vm0, %v39_v5  ;;  %486 = vmatprep.subr.bf16.mxu0 %v485_v3  ;;  %v40_v8 = vld [vmem:[%s777_s0 + $0x28] sm:$0xff]  ;;  %v37_v9 = vld [vmem:[%s777_s0 + $0x10] sm:$0xff] }
   0x5   :  { %489 = vmatprep.subr.bf16.mxu1 %v485_v3  ;;  %488 = vmatpush3.bf16.msra.mxu0 %v485_v3  ;;  %v41_v10 = vld [vmem:[%s777_s0 + $0x30] sm:$0xff]  ;;  %v38_v11 = vld [vmem:[%s777_s0 + $0x18] sm:$0xff]  ;;  %v455_v37 = vld [vmem:[%s778_s2] ss:$0 sm:$0xff] }
   0x6   :  { %491 = vmatpush3.bf16.msra.mxu1 %v485_v3  ;;  %471 = vmatprep.subr.mxu0 %v45_v6  ;;  %v42_v12 = vld [vmem:[%s777_s0 + $0x38] sm:$0xff] }
   0x7   :  { %490 = vmatprep.subr.mxu1 %v45_v6 }
   0x8   :  { %v28_v13 = vld [vmem:[#allocation2 + $0x8] sm:$0xff]  ;;  %v27_v15 = vld [vmem:[#allocation2] sm:$0xff] }
   0x9   :  { %472 = vmatpush3.msra.mxu0 %v45_v6  ;;  %v30_v25 = vld [vmem:[#allocation2 + $0x18] sm:$0xff]  ;;  %v29_v27 = vld [vmem:[#allocation2 + $0x10] sm:$0xff] }
   0xa   :  { %492 = vmatpush3.msra.mxu1 %v45_v6  ;;  %474 = vmatmul.mubr.msk.f32.vlgmr.msra.gmra.mrb[0].mxu0 %vm46_vm0, %v36_v7  ;;  %v32_v14 = vld [vmem:[#allocation2 + $0x28] sm:$0xff]  ;;  %v31_v16 = vld [vmem:[#allocation2 + $0x20] sm:$0xff] }
   0xb   :  { %480 = vmatmul.mubr.msk.f32.vlgmr.msra.gmra.mrb[0].mxu1 %vm46_vm0, %v40_v8  ;;  %476 = vmatprep.mubr.msk.f32.mxu0 %vm46_vm0, %v37_v9  ;;  %v34_v26 = vld [vmem:[#allocation2 + $0x38] sm:$0xff]  ;;  %v33_v28 = vld [vmem:[#allocation2 + $0x30] sm:$0xff] }
   0xc   :  { %482 = vmatprep.mubr.msk.f32.mxu1 %vm46_vm0, %v41_v10 }
   0xe   :  { %477 = vmatmul.mubr.msk.f32.gmra.mrb[2].mxu0 %vm46_vm0, %v38_v11 }
   0xf   :  { %483 = vmatmul.mubr.msk.f32.gmra.mrb[2].mxu1 %vm46_vm0, %v42_v12 }
  0xdd   :  { %v475_v17 = vpop.f32.mrb[0].mxu0 }
  0xde   :  { %v481_v18 = vpop.f32.mrb[0].mxu1  ;;  %v177_v19 = vadd.f32 %v475_v17, %v28_v13  ;;  %v137_v21 = vpop.f32.mrb[1].mxu0 }
  0xdf   :  { %v181_v20 = vadd.f32 %v481_v18, %v32_v14  ;;  %v157_v22 = vpop.f32.mrb[1].mxu1  ;;  %v176_v23 = vadd.f32 %v137_v21, %v27_v15 }
  0xe0   :  { %v180_v24 = vadd.f32 %v157_v22, %v31_v16  ;;  %186 = vst.msk [vmem:[#allocation2 + $0x8] sm:$0xff] %vm18_vm1, %v177_v19 }
  0xe1   :  { %190 = vst.msk [vmem:[#allocation2 + $0x28] sm:$0xff] %vm18_vm1, %v181_v20  ;;  %185 = vst.msk [vmem:[#allocation2] sm:$0xff] %vm18_vm1, %v176_v23  ;;  %v478_v29 = vpop.f32.mrb[2].mxu0 }
  0xe2   :  { %189 = vst.msk [vmem:[#allocation2 + $0x20] sm:$0xff] %vm18_vm1, %v180_v24  ;;  %v484_v30 = vpop.f32.mrb[2].mxu1  ;;  %v179_v31 = vadd.f32 %v478_v29, %v30_v25  ;;  %v147_v33 = vpop.f32.mrb[3].mxu0 }
  0xe3   :  { %v183_v32 = vadd.f32 %v484_v30, %v34_v26  ;;  %v167_v34 = vpop.f32.mrb[3].mxu1  ;;  %v178_v35 = vadd.f32 %v147_v33, %v29_v27 }
  0xe4   :  { %v182_v36 = vadd.f32 %v167_v34, %v33_v28  ;;  %188 = vst.msk [vmem:[#allocation2 + $0x18] sm:$0xff] %vm18_vm1, %v179_v31 }
  0xe5   :  { %192 = vst.msk [vmem:[#allocation2 + $0x38] sm:$0xff] %vm18_vm1, %v183_v32  ;;  %187 = vst.msk [vmem:[#allocation2 + $0x10] sm:$0xff] %vm18_vm1, %v178_v35 }
  0xe6   :  { %191 = vst.msk [vmem:[#allocation2 + $0x30] sm:$0xff] %vm18_vm1, %v182_v36 }
  0xe7   :  { %v197_v38 = vld [vmem:[#allocation2 + $0x8] sm:$0xff] }
  0xe8   :  { %v201_v39 = vld [vmem:[#allocation2 + $0x28] sm:$0xff]  ;;  %v607_v40 = vadd.f32 %v455_v37, %v197_v38  ;;  %v196_v42 = vld [vmem:[#allocation2] sm:$0xff] }
  0xe9   :  { %v609_v41 = vadd.f32 %v455_v37, %v201_v39  ;;  %v200_v43 = vld [vmem:[#allocation2 + $0x20] sm:$0xff]  ;;  %v611_v44 = vadd.f32 %v455_v37, %v196_v42 }
  0xea   :  { %v613_v45 = vadd.f32 %v455_v37, %v200_v43  ;;  %v616_v46 = vmul.f32 0.70710677, %v607_v40  ;;  %v662_v39 = vmul.f32 0.5, %v607_v40 }
  0xeb   :  { %v619_v47 = vmul.f32 0.70710677, %v609_v41  ;;  %v622_v48 = vmul.f32 0.70710677, %v611_v44  ;;  %v199_v60 = vld [vmem:[#allocation2 + $0x18] sm:$0xff] }
  0xec   :  { %v625_v49 = vmul.f32 0.70710677, %v613_v45  ;;  %v236_v50 = vand.u32 2147483647, %v616_v46  ;;  %v203_v61 = vld [vmem:[#allocation2 + $0x38] sm:$0xff]  ;;  %v198_v62 = vld [vmem:[#allocation2 + $0x10] sm:$0xff]  ;;  %v631_v0 = vadd.f32 %v455_v37, %v199_v60 }
  0xed   :  { %v240_v51 = vand.u32 2147483647, %v619_v47  ;;  %v235_v52 = vand.u32 2147483647, %v622_v48  ;;  %v633_v1 = vadd.f32 %v455_v37, %v203_v61  ;;  %v202_v2 = vld [vmem:[#allocation2 + $0x30] sm:$0xff]  ;;  %v638_v6 = vadd.f32 %v455_v37, %v198_v62 }
  0xee   :  { %v239_v53 = vand.u32 2147483647, %v625_v49  ;;  %v244_v54 = vmul.f32 0.3275911, %v236_v50  ;;  %v348_v3 = vsub.f32 0.0, %v236_v50  ;;  %v644_v10 = vadd.f32 %v455_v37, %v202_v2 }
  0xef   :  { %v248_v55 = vmul.f32 0.3275911, %v240_v51  ;;  %v243_v56 = vmul.f32 0.3275911, %v235_v52  ;;  %v636_v5 = vmul.f32 0.70710677, %v631_v0 }
  0xf0   :  { %v252_v57 = vadd.f32 1.0, %v244_v54  ;;  %v247_v59 = vmul.f32 0.3275911, %v239_v53  ;;  %v352_v7 = vsub.f32 0.0, %v240_v51  ;;  %v641_v8 = vmul.f32 0.70710677, %v633_v1 }
  0xf1   :  { %v256_v58 = vadd.f32 1.0, %v248_v55  ;;  %v251_v63 = vadd.f32 1.0, %v243_v56  ;;  %v238_v9 = vand.u32 2147483647, %v636_v5  ;;  %v347_v11 = vsub.f32 0.0, %v235_v52 }
  0xf2   :  { %494 = vrcp.f32 %v252_v57  ;;  %v255_v4 = vadd.f32 1.0, %v247_v59  ;;  %v242_v12 = vand.u32 2147483647, %v641_v8  ;;  %v648_v13 = vmul.f32 0.70710677, %v638_v6 }
  0xf3   :  { %496 = vrcp.f32 %v256_v58  ;;  %v356_v14 = vmul.f32 %v348_v3, %v236_v50  ;;  %v351_v15 = vsub.f32 0.0, %v239_v53  ;;  %v246_v16 = vmul.f32 0.3275911, %v238_v9 }
  0xf4   :  { %498 = vrcp.f32 %v251_v63  ;;  %v360_v17 = vmul.f32 %v352_v7, %v240_v51  ;;  %v250_v18 = vmul.f32 0.3275911, %v242_v12  ;;  %v237_v19 = vand.u32 2147483647, %v648_v13 }
  0xf5   :  { %500 = vrcp.f32 %v255_v4  ;;  %v254_v20 = vadd.f32 1.0, %v246_v16  ;;  %v350_v21 = vsub.f32 0.0, %v238_v9  ;;  %v652_v22 = vmul.f32 0.70710677, %v644_v10 }
  0xf6   :  { %v355_v23 = vmul.f32 %v347_v11, %v235_v52  ;;  %v258_v24 = vadd.f32 1.0, %v250_v18  ;;  %v354_v25 = vsub.f32 0.0, %v242_v12  ;;  %v245_v26 = vmul.f32 0.3275911, %v237_v19 }
  0xf7   :  { %v365_v28 = vmul.f32 1.442695, %v356_v14  ;;  %v359_v29 = vmul.f32 %v351_v15, %v239_v53  ;;  %502 = vrcp.f32 %v254_v20  ;;  %v241_v30 = vand.u32 2147483647, %v652_v22 }
  0xf8   :  { %v373_v33 = vmul.f32 1.442695, %v360_v17  ;;  %504 = vrcp.f32 %v258_v24  ;;  %v253_v34 = vadd.f32 1.0, %v245_v26  ;;  %v358_v36 = vmul.f32 %v350_v21, %v238_v9 }
  0xf9   :  { %v349_v37 = vsub.f32 0.0, %v237_v19  ;;  %v249_v38 = vmul.f32 0.3275911, %v241_v30  ;;  %v363_v43 = vmul.f32 1.442695, %v355_v23  ;;  %v362_v50 = vmul.f32 %v354_v25, %v242_v12 }
  0xfa   :  { %506 = vrcp.f32 %v253_v34  ;;  %v353_v54 = vsub.f32 0.0, %v241_v30  ;;  %v371_v57 = vmul.f32 1.442695, %v359_v29  ;;  %v369_v59 = vmul.f32 1.442695, %v358_v36 }
  0xfb   :  { %v257_v53 = vadd.f32 1.0, %v249_v38  ;;  %508 = vpow2.f32 %v365_v28  ;;  %v357_v60 = vmul.f32 %v349_v37, %v237_v19  ;;  %v377_v3 = vmul.f32 1.442695, %v362_v50 }
  0xfc   :  { %v654_v27 = vpop.eup %494  ;;  %510 = vpow2.f32 %v373_v33  ;;  %v361_v4 = vmul.f32 %v353_v54, %v241_v30  ;;  %v677_v14 = vmul.f32 0.5, %v609_v41  ;;  %v691_v33 = vmul.f32 0.5, %v611_v44 }
  0xfd   :  { %v657_v31 = vpop.eup %496  ;;  %v276_v32 = vmul.f32 1.0614054, %v654_v27  ;;  %512 = vrcp.f32 %v257_v53  ;;  %v367_v16 = vmul.f32 1.442695, %v357_v60  ;;  %vm396_vm2 = vcmp.ge.f32.partialorder %v616_v46, 0.0 }
  0xfe   :  { %v280_v35 = vmul.f32 1.0614054, %v657_v31  ;;  %v664_v51 = vpop.eup %498  ;;  %514 = vpow2.f32 %v363_v43  ;;  %v375_v25 = vmul.f32 1.442695, %v361_v4  ;;  %vm400_vm3 = vcmp.ge.f32.partialorder %v619_v47, 0.0 }
  0xff   :  { %v284_v42 = vadd.f32 -1.4531521, %v276_v32  ;;  %v275_v56 = vmul.f32 1.0614054, %v664_v51  ;;  %v668_v58 = vpop.eup %500  ;;  %516 = vpow2.f32 %v371_v57  ;;  %vm395_vm4 = vcmp.ge.f32.partialorder %v622_v48, 0.0 }
 0x100   :  { %v288_v52 = vadd.f32 -1.4531521, %v280_v35  ;;  %v279_v63 = vmul.f32 1.0614054, %v668_v58  ;;  %518 = vpow2.f32 %v369_v59  ;;  %vm399_vm5 = vcmp.ge.f32.partialorder %v625_v49, 0.0 }
 0x101   :  { %v292_v55 = vmul.f32 %v654_v27, %v284_v42  ;;  %v283_v62 = vadd.f32 -1.4531521, %v275_v56  ;;  %v674_v12 = vpop.eup %502  ;;  %520 = vpow2.f32 %v377_v3  ;;  %vm398_vm6 = vcmp.ge.f32.partialorder %v636_v5, 0.0 }
 0x102   :  { %v296_v40 = vmul.f32 %v657_v31, %v288_v52  ;;  %v287_v11 = vadd.f32 -1.4531521, %v279_v63  ;;  %v680_v17 = vpop.eup %504  ;;  %v278_v21 = vmul.f32 1.0614054, %v674_v12  ;;  %522 = vpow2.f32 %v367_v16 }
 0x103   :  { %v300_v61 = vadd.f32 1.4214138, %v292_v55  ;;  %v291_v9 = vmul.f32 %v664_v51, %v283_v62  ;;  %v282_v24 = vmul.f32 1.0614054, %v680_v17  ;;  %524 = vpow2.f32 %v375_v25 }
 0x104   :  { %v304_v2 = vadd.f32 1.4214138, %v296_v40  ;;  %v295_v20 = vmul.f32 %v668_v58, %v287_v11  ;;  %v286_v29 = vadd.f32 -1.4531521, %v278_v21  ;;  %v687_v30 = vpop.eup %506  ;;  %vm402_vm7 = vcmp.ge.f32.partialorder %v641_v8, 0.0 }
 0x105   :  { %v308_v7 = vmul.f32 %v654_v27, %v300_v61  ;;  %v299_v19 = vadd.f32 1.4214138, %v291_v9  ;;  %v290_v34 = vadd.f32 -1.4531521, %v282_v24  ;;  %v509_v35 = vpop.eup %508  ;;  %v277_v53 = vmul.f32 1.0614054, %v687_v30 }
 0x106   :  { %v312_v15 = vmul.f32 %v657_v31, %v304_v2  ;;  %v303_v28 = vadd.f32 1.4214138, %v295_v20  ;;  %v294_v42 = vmul.f32 %v674_v12, %v286_v29  ;;  %v511_v43 = vpop.eup %510  ;;  %vm397_vm8 = vcmp.ge.f32.partialorder %v648_v13, 0.0 }
 0x107   :  { %v316_v18 = vadd.f32 -0.28449672, %v308_v7  ;;  %v307_v26 = vmul.f32 %v664_v51, %v299_v19  ;;  %v298_v52 = vmul.f32 %v680_v17, %v290_v34  ;;  %v698_v44 = vpop.eup %512  ;;  %v285_v61 = vadd.f32 -1.4531521, %v277_v53 }
 0x108   :  { %v320_v23 = vadd.f32 -0.28449672, %v312_v15  ;;  %v311_v38 = vmul.f32 %v668_v58, %v303_v28  ;;  %v302_v57 = vadd.f32 1.4214138, %v294_v42  ;;  %v515_v40 = vpop.eup %514  ;;  %v281_v62 = vmul.f32 1.0614054, %v698_v44 }
 0x109   :  { %v324_v41 = vmul.f32 %v654_v27, %v316_v18  ;;  %v315_v37 = vadd.f32 -0.28449672, %v307_v26  ;;  %v306_v60 = vadd.f32 1.4214138, %v298_v52  ;;  %v517_v63 = vpop.eup %516  ;;  %v293_v15 = vmul.f32 %v687_v30, %v285_v61 }
 0x10a   :  { %v328_v32 = vmul.f32 %v657_v31, %v320_v23  ;;  %v319_v56 = vadd.f32 -0.28449672, %v311_v38  ;;  %v519_v7 = vpop.eup %518  ;;  %vm401_vm9 = vcmp.ge.f32.partialorder %v652_v22, 0.0 }
 0x10b   :  { %v332_v36 = vadd.f32 0.2548296, %v324_v41  ;;  %v323_v55 = vmul.f32 %v664_v51, %v315_v37  ;;  %v314_v11 = vmul.f32 %v680_v17, %v306_v60  ;;  %v521_v21 = vpop.eup %520  ;;  %v301_v25 = vadd.f32 1.4214138, %v293_v15 }
 0x10c   :  { %v336_v50 = vadd.f32 0.2548296, %v328_v32  ;;  %v327_v4 = vmul.f32 %v668_v58, %v319_v56  ;;  %v523_v34 = vpop.eup %522 }
 0x10d   :  { %v340_v54 = vmul.f32 %v654_v27, %v332_v36  ;;  %v331_v3 = vadd.f32 0.2548296, %v323_v55  ;;  %v310_v27 = vmul.f32 %v674_v12, %v302_v57  ;;  %v322_v24 = vadd.f32 -0.28449672, %v314_v11  ;;  %v525_v52 = vpop.eup %524 }
 0x10e   :  { %v344_v59 = vmul.f32 %v657_v31, %v336_v50  ;;  %v289_v31 = vadd.f32 -1.4531521, %v281_v62  ;;  %v335_v19 = vadd.f32 0.2548296, %v327_v4  ;;  %v309_v36 = vmul.f32 %v687_v30, %v301_v25 }
 0x10f   :  { %v380_v2 = vmul.f32 %v509_v35, %v340_v54  ;;  %v339_v18 = vmul.f32 %v664_v51, %v331_v3  ;;  %v318_v20 = vadd.f32 -0.28449672, %v310_v27  ;;  %v330_v51 = vmul.f32 %v680_v17, %v322_v24 }
 0x110   :  { %v384_v9 = vmul.f32 %v511_v43, %v344_v59  ;;  %v297_v41 = vmul.f32 %v698_v44, %v289_v31  ;;  %v343_v29 = vmul.f32 %v668_v58, %v335_v19  ;;  %v317_v55 = vadd.f32 -0.28449672, %v309_v36 }
 0x111   :  { %v388_v16 = vsub.f32 1.0, %v380_v2  ;;  %v379_v28 = vmul.f32 %v515_v40, %v339_v18  ;;  %v326_v32 = vmul.f32 %v674_v12, %v318_v20  ;;  %v338_v54 = vadd.f32 0.2548296, %v330_v51 }
 0x112   :  { %v392_v23 = vsub.f32 1.0, %v384_v9  ;;  %v305_v37 = vadd.f32 1.4214138, %v297_v41  ;;  %v383_v43 = vmul.f32 %v517_v63, %v343_v29  ;;  %v325_v61 = vmul.f32 %v687_v30, %v317_v55 }
 0x113   :  { %v404_v26 = vsub.f32 0.0, %v388_v16  ;;  %v387_v42 = vsub.f32 1.0, %v379_v28  ;;  %v334_v50 = vadd.f32 0.2548296, %v326_v32  ;;  %v346_v46 = vmul.f32 %v680_v17, %v338_v54 }
 0x114   :  { %v408_v35 = vsub.f32 0.0, %v392_v23  ;;  %v391_v40 = vsub.f32 1.0, %v383_v43  ;;  %v313_v62 = vmul.f32 %v698_v44, %v305_v37  ;;  %v333_v4 = vadd.f32 0.2548296, %v325_v61 }
 0x115   :  { %v412_v38 = vsel %vm396_vm2, %v388_v16, %v404_v26  ;;  %v403_v57 = vsub.f32 0.0, %v387_v42  ;;  %v342_v59 = vmul.f32 %v674_v12, %v334_v50  ;;  %v226_v24 = vmul.f32 0.5, %v633_v1 }
 0x116   :  { %v420_v53 = vadd.f32 1.0, %v412_v38  ;;  %v416_v58 = vsel %vm400_vm3, %v392_v23, %v408_v35  ;;  %v407_v2 = vsub.f32 0.0, %v391_v40  ;;  %v321_v17 = vadd.f32 -0.28449672, %v313_v62 }
 0x117   :  { %v424_v56 = vadd.f32 1.0, %v416_v58  ;;  %v411_v47 = vsel %vm395_vm4, %v387_v42, %v403_v57  ;;  %v382_v3 = vmul.f32 %v519_v7, %v342_v59  ;;  %v341_v15 = vmul.f32 %v687_v30, %v333_v4 }
 0x118   :  { %v428_v60 = vmul.f32 %v420_v53, %v662_v39  ;;  %v419_v12 = vadd.f32 1.0, %v411_v47  ;;  %v386_v39 = vmul.f32 %v521_v21, %v346_v46  ;;  %v415_v48 = vsel %vm399_vm5, %v391_v40, %v407_v2 }
 0x119   :  { %v432_v63 = vmul.f32 %v424_v56, %v677_v14  ;;  %v223_v14 = vmul.f32 0.5, %v613_v45  ;;  %v390_v27 = vsub.f32 1.0, %v382_v3  ;;  %v423_v9 = vadd.f32 1.0, %v415_v48 }
 0x11a   :  { %436 = vst.msk [vmem:[%s779_s3 + $0x8] sm:$0xff] %vm18_vm1, %v428_v60  ;;  %v427_v7 = vmul.f32 %v419_v12, %v691_v33  ;;  %v394_v11 = vsub.f32 1.0, %v386_v39  ;;  %v329_v16 = vmul.f32 %v698_v44, %v321_v17  ;;  %v381_v49 = vmul.f32 %v523_v34, %v341_v15 }
 0x11b   :  { %440 = vst.msk [vmem:[%s779_s3 + $0x28] sm:$0xff] %vm18_vm1, %v432_v63  ;;  %v406_v31 = vsub.f32 0.0, %v390_v27  ;;  %v431_v18 = vmul.f32 %v423_v9, %v223_v14  ;;  %v222_v30 = vmul.f32 0.5, %v631_v0  ;;  %v221_v1 = vmul.f32 0.5, %v638_v6 }
 0x11c   :  { %435 = vst.msk [vmem:[%s779_s3] sm:$0xff] %vm18_vm1, %v427_v7  ;;  %v410_v45 = vsub.f32 0.0, %v394_v11  ;;  %v337_v33 = vadd.f32 0.2548296, %v329_v16  ;;  %v389_v23 = vsub.f32 1.0, %v381_v49  ;;  %v225_v35 = vmul.f32 0.5, %v644_v10 }
 0x11d   :  { %v414_v19 = vsel %vm398_vm6, %v390_v27, %v406_v31  ;;  %439 = vst.msk [vmem:[%s779_s3 + $0x20] sm:$0xff] %vm18_vm1, %v431_v18 }
 0x11e   :  { %v422_v20 = vadd.f32 1.0, %v414_v19  ;;  %v418_v21 = vsel %vm402_vm7, %v394_v11, %v410_v45  ;;  %v345_v5 = vmul.f32 %v698_v44, %v337_v33  ;;  %v405_v26 = vsub.f32 0.0, %v389_v23 }
 0x11f   :  { %v426_v25 = vadd.f32 1.0, %v418_v21 }
 0x120   :  { %v430_v41 = vmul.f32 %v422_v20, %v222_v30  ;;  %v385_v8 = vmul.f32 %v525_v52, %v345_v5  ;;  %v413_v0 = vsel %vm397_vm8, %v389_v23, %v405_v26 }
 0x121   :  { %v434_v28 = vmul.f32 %v426_v25, %v226_v24  ;;  %v421_v44 = vadd.f32 1.0, %v413_v0 }
 0x122   :  { %438 = vst.msk [vmem:[%s779_s3 + $0x18] sm:$0xff] %vm18_vm1, %v430_v41  ;;  %v393_v29 = vsub.f32 1.0, %v385_v8 }
 0x123   :  { %442 = vst.msk [vmem:[%s779_s3 + $0x38] sm:$0xff] %vm18_vm1, %v434_v28  ;;  %v429_v32 = vmul.f32 %v421_v44, %v221_v1 }
 0x124   :  { %v409_v34 = vsub.f32 0.0, %v393_v29 }
 0x125   :  { %437 = vst.msk [vmem:[%s779_s3 + $0x10] sm:$0xff] %vm18_vm1, %v429_v32 }
 0x126   :  { %v417_v13 = vsel %vm401_vm9, %v393_v29, %v409_v34 }
 0x127   :  { %v425_v51 = vadd.f32 1.0, %v417_v13 }
 0x129   :  { %v433_v36 = vmul.f32 %v425_v51, %v225_v35 }
 0x12b   :  { %441 = vst.msk [vmem:[%s779_s3 + $0x30] sm:$0xff] %vm18_vm1, %v433_v36 }

</bundles_post_ra>
